<compile_context>
chip_gen: v7x
topology: tpu7x:2x2x1
jax: 0.10.0
libtpu: 0.0.40
codegen_flags: <defaults>
</compile_context>

<pallas_src>
import functools

import jax
import jax.numpy as jnp
from jax.experimental import pallas as pl
from jax.experimental.pallas import tpu as pltpu

N_LABELS = 8       # len(['anger', ..., 'trust'])
HIDDEN_UNITS = 64  # nn.Linear(hidden_size, 64)


def _round_up(x, m):
    return (x + m - 1) // m * m


def _head_kernel(h_ref, w1_ref, b1_ref, w2_ref, b2_ref, y_ref,
                 logits_ref, bce_ref, pooled_acc, *, inv_seq_len):
    """mean-pool (streamed over seq) -> linear -> relu -> linear -> BCE."""
    s = pl.program_id(1)

    @pl.when(s == 0)
    def _():
        pooled_acc[...] = jnp.zeros_like(pooled_acc)

    # Streamed partial sum over the sequence axis; bf16 in, f32 accumulation.
    h = h_ref[...].astype(jnp.float32)                     # (TB, TS, H)
    pooled_acc[...] += jnp.sum(h, axis=1)                  # (TB, H)

    @pl.when(s == pl.num_programs(1) - 1)
    def _():
        # Divide by the TRUE sequence length (zero-padded seq rows add 0).
        pooled = pooled_acc[...] * inv_seq_len             # (TB, H)

        # TODO(synk): nn.Dropout() is stochastic in training mode; eval-mode
        # (identity) semantics are implemented here.

        # self.hidden(pooled) ; F.relu
        hid = jnp.dot(pooled, w1_ref[...],
                      preferred_element_type=jnp.float32) + b1_ref[...]
        hid = jnp.maximum(hid, 0.0)                        # (TB, 64)

        # self.classifier(hid)
        logits = jnp.dot(hid, w2_ref[...],
                         preferred_element_type=jnp.float32) + b2_ref[...]
        logits_ref[...] = logits.astype(logits_ref.dtype)  # (TB, n_labels)

        # BCEWithLogitsLoss, numerically stable:
        #   max(x,0) - x*y + log(1 + exp(-|x|)); per-element terms.
        y = y_ref[...].astype(jnp.float32)
        bce_ref[...] = (jnp.maximum(logits, 0.0)
                        - logits * y
                        + jnp.log(1.0 + jnp.exp(-jnp.abs(logits))))


def emotion_head_forward(last_hidden_state, w1, b1, w2, b2, labels,
                         *, tb=8, ts=256):
    """Runs the Pallas kernel.  Returns (loss_scalar, logits).

    tb: batch tile (rounded to a multiple of 8).
    ts: sequence tile (rounded to a multiple of 8).  Defaults keep the
        double-buffered activation tile well under the default scoped-VMEM
        limits even at distilroberta shapes (H=768) in bf16.
    """
    B, S, H = last_hidden_state.shape
    n_labels = w2.shape[1]

    tb = _round_up(max(1, min(tb, B)), 8)
    ts = _round_up(max(1, min(ts, S)), 8)
    b_pad = _round_up(B, tb)
    s_pad = _round_up(S, ts)

    # bf16 activation stream (halves HBM bytes); f32 accumulation in-kernel.
    h = last_hidden_state.astype(jnp.bfloat16)
    if (b_pad, s_pad) != (B, S):
        h = jnp.pad(h, ((0, b_pad - B), (0, s_pad - S), (0, 0)))
    y = labels.astype(jnp.float32)
    if b_pad != B:
        y = jnp.pad(y, ((0, b_pad - B), (0, 0)))

    grid = (b_pad // tb, s_pad // ts)
    kernel = functools.partial(_head_kernel, inv_seq_len=1.0 / S)

    logits_padded, bce_padded = pl.pallas_call(
        kernel,
        out_shape=(
            jax.ShapeDtypeStruct((b_pad, n_labels), jnp.float32),
            jax.ShapeDtypeStruct((b_pad, n_labels), jnp.float32),
        ),
        grid_spec=pltpu.PrefetchScalarGridSpec(
            num_scalar_prefetch=0,
            grid=grid,
            in_specs=[
                # Activation: streamed, double-buffered per (batch, seq) tile.
                pl.BlockSpec((tb, ts, H), lambda b, s: (b, s, 0)),
                # Weights / biases: constant blocks, fetched once.
                pl.BlockSpec((H, HIDDEN_UNITS), lambda b, s: (0, 0)),
                pl.BlockSpec((1, HIDDEN_UNITS), lambda b, s: (0, 0)),
                pl.BlockSpec((HIDDEN_UNITS, n_labels), lambda b, s: (0, 0)),
                pl.BlockSpec((1, n_labels), lambda b, s: (0, 0)),
                # Labels: per-batch-tile, resident across the seq axis.
                pl.BlockSpec((tb, n_labels), lambda b, s: (b, 0)),
            ],
            out_specs=[
                pl.BlockSpec((tb, n_labels), lambda b, s: (b, 0)),  # logits
                pl.BlockSpec((tb, n_labels), lambda b, s: (b, 0)),  # BCE terms
            ],
            scratch_shapes=[pltpu.VMEM((tb, H), jnp.float32)],      # pooled acc
        ),
        compiler_params=pltpu.CompilerParams(
            dimension_semantics=("parallel", "arbitrary"),
            vmem_limit_bytes=32 * 1024 * 1024,
        ),
    )(h, w1, b1, w2, b2, y)

    logits = logits_padded[:B]
    # mean over the TRUE B * n_labels elements (padded batch rows dropped).
    loss = jnp.sum(bce_padded[:B]) / (B * n_labels)
    return loss, logits


def init_params(key, hidden_size):
    """Deterministic parameter init matching the module's shapes."""
    k1, k2, k3, k4 = jax.random.split(key, 4)
    # hidden = nn.Linear(hidden_size, 64): default uniform(-1/sqrt(fan_in), ..)
    lim1 = 1.0 / jnp.sqrt(hidden_size)
    w1 = jax.random.uniform(k1, (hidden_size, HIDDEN_UNITS),
                            minval=-lim1, maxval=lim1, dtype=jnp.float32)
    b1 = jax.random.uniform(k2, (1, HIDDEN_UNITS),
                            minval=-lim1, maxval=lim1, dtype=jnp.float32)
    # classifier = nn.Linear(64, n_labels) with xavier_uniform_ on the weight
    lim2 = jnp.sqrt(6.0 / (HIDDEN_UNITS + N_LABELS))
    w2 = jax.random.uniform(k3, (HIDDEN_UNITS, N_LABELS),
                            minval=-lim2, maxval=lim2, dtype=jnp.float32)
    lim2b = 1.0 / jnp.sqrt(HIDDEN_UNITS)
    b2 = jax.random.uniform(k4, (1, N_LABELS),
                            minval=-lim2b, maxval=lim2b, dtype=jnp.float32)
    return w1, b1, w2, b2


if __name__ == "__main__":
    # Small shapes consistent with the forward pass:
    #   batch=2, seq=8, hidden_size=32 (stand-in for distilroberta's 768)
    B, S, H = 2, 8, 32
    key = jax.random.PRNGKey(0)
    k_h, k_y, k_p = jax.random.split(key, 3)

    # TODO(synk): the pretrained transformer backbone (AutoModel) is not
    # implemented in Pallas; its output (last_hidden_state) is synthesized.
    last_hidden_state = jax.random.normal(k_h, (B, S, H), dtype=jnp.float32)
    labels = jax.random.bernoulli(k_y, 0.5, (B, N_LABELS)).astype(jnp.float32)

    w1, b1, w2, b2 = init_params(k_p, H)

    loss, logits = emotion_head_forward(last_hidden_state, w1, b1, w2, b2,
                                        labels)
    jax.block_until_ready((loss, logits))

    # Pure-JAX reference of the same head (same bf16 input stream as kernel).
    h_ref = last_hidden_state.astype(jnp.bfloat16).astype(jnp.float32)
    pooled = jnp.mean(h_ref, axis=1)
    hid = jnp.maximum(
        jnp.dot(pooled, w1, precision=jax.lax.Precision.HIGHEST) + b1, 0.0)
    logits_ref = jnp.dot(hid, w2, precision=jax.lax.Precision.HIGHEST) + b2
    per = (jnp.maximum(logits_ref, 0.0) - logits_ref * labels
           + jnp.log1p(jnp.exp(-jnp.abs(logits_ref))))
    loss_ref = jnp.mean(per)

    assert jnp.allclose(logits, logits_ref, atol=1e-2, rtol=1e-2), (
        logits, logits_ref)
    assert jnp.allclose(loss, loss_ref, atol=1e-2, rtol=1e-2), (loss, loss_ref)

    print("KERNEL_OK")
</pallas_src>

<mosaic_0001>
module attributes {stable_mosaic.version = 11 : i64} {
  func.func @_head_kernel(%arg0: i32, %arg1: i32, %arg2: memref<8x8x32xbf16, #tpu.memory_space<vmem>>, %arg3: memref<32x64xf32, #tpu.memory_space<vmem>>, %arg4: memref<1x64xf32, #tpu.memory_space<vmem>>, %arg5: memref<64x8xf32, #tpu.memory_space<vmem>>, %arg6: memref<1x8xf32, #tpu.memory_space<vmem>>, %arg7: memref<8x8xf32, #tpu.memory_space<vmem>>, %arg8: memref<8x8xf32, #tpu.memory_space<vmem>>, %arg9: memref<8x8xf32, #tpu.memory_space<vmem>>, %arg10: memref<8x32xf32, #tpu.memory_space<vmem>>) attributes {dimension_semantics = [#tpu.dimension_semantics<parallel>, #tpu.dimension_semantics<arbitrary>], iteration_bounds = array<i64: 1, 1>, scalar_prefetch = 0 : i64, scratch_operands = 1 : i64, tpu.core_type = #tpu.core_type<tc>, window_params = [{transform_indices = @transform_0, window_bounds = array<i64: 8, 8, 32>}, {pipeline_mode = #tpu.pipeline_mode<synchronous>, transform_indices = @transform_1, window_bounds = array<i64: 32, 64>}, {pipeline_mode = #tpu.pipeline_mode<synchronous>, transform_indices = @transform_2, window_bounds = array<i64: 1, 64>}, {pipeline_mode = #tpu.pipeline_mode<synchronous>, transform_indices = @transform_3, window_bounds = array<i64: 64, 8>}, {pipeline_mode = #tpu.pipeline_mode<synchronous>, transform_indices = @transform_4, window_bounds = array<i64: 1, 8>}, {transform_indices = @transform_5, window_bounds = array<i64: 8, 8>}, {transform_indices = @transform_6, window_bounds = array<i64: 8, 8>}, {transform_indices = @transform_7, window_bounds = array<i64: 8, 8>}]} {
    %c0_i32 = arith.constant 0 : i32
    %0 = arith.cmpi eq, %arg1, %c0_i32 : i32
    %1 = arith.extui %0 : i1 to i32
    %c0_i32_0 = arith.constant 0 : i32
    %2 = arith.cmpi ne, %1, %c0_i32_0 : i32
    scf.if %2 {
      %cst_9 = arith.constant 0.000000e+00 : f32
      %12 = vector.broadcast %cst_9 : f32 to vector<8x32xf32>
      %c0_10 = arith.constant 0 : index
      %c0_11 = arith.constant 0 : index
      %13 = vector.load %arg10[%c0_10, %c0_11] : memref<8x32xf32, #tpu.memory_space<vmem>>, vector<8x32xf32>
      tpu.vector_store %arg10[%c0_10, %c0_11], %12 {strides = array<i32>} : memref<8x32xf32, #tpu.memory_space<vmem>>, vector<8x32xf32>,
    } else {
    }
    %c0 = arith.constant 0 : index
    %c0_1 = arith.constant 0 : index
    %c0_2 = arith.constant 0 : index
    %3 = vector.load %arg2[%c0, %c0_1, %c0_2] : memref<8x8x32xbf16, #tpu.memory_space<vmem>>, vector<8x8x32xbf16>
    %4 = arith.extf %3 : vector<8x8x32xbf16> to vector<8x8x32xf32>
    %c0_3 = arith.constant 0 : index
    %c0_4 = arith.constant 0 : index
    %5 = vector.load %arg10[%c0_3, %c0_4] : memref<8x32xf32, #tpu.memory_space<vmem>>, vector<8x32xf32>
    %cst = arith.constant dense<0.000000e+00> : vector<8x32xf32>
    %6 = vector.multi_reduction <add>, %4, %cst [1] : vector<8x8x32xf32> to vector<8x32xf32>
    %7 = arith.addf %5, %6 : vector<8x32xf32>
    %c0_5 = arith.constant 0 : index
    %c0_6 = arith.constant 0 : index
    %8 = vector.load %arg10[%c0_5, %c0_6] : memref<8x32xf32, #tpu.memory_space<vmem>>, vector<8x32xf32>
    tpu.vector_store %arg10[%c0_5, %c0_6], %7 {strides = array<i32>} : memref<8x32xf32, #tpu.memory_space<vmem>>, vector<8x32xf32>,
    %c0_i32_7 = arith.constant 0 : i32
    %9 = arith.cmpi eq, %arg1, %c0_i32_7 : i32
    %10 = arith.extui %9 : i1 to i32
    %c0_i32_8 = arith.constant 0 : i32
    %11 = arith.cmpi ne, %10, %c0_i32_8 : i32
    scf.if %11 {
      %c0_9 = arith.constant 0 : index
      %c0_10 = arith.constant 0 : index
      %12 = vector.load %arg10[%c0_9, %c0_10] : memref<8x32xf32, #tpu.memory_space<vmem>>, vector<8x32xf32>
      %cst_11 = arith.constant 1.250000e-01 : f32
      %13 = vector.broadcast %cst_11 : f32 to vector<8x32xf32>
      %14 = arith.mulf %12, %13 : vector<8x32xf32>
      %c0_12 = arith.constant 0 : index
      %c0_13 = arith.constant 0 : index
      %15 = vector.load %arg3[%c0_12, %c0_13] : memref<32x64xf32, #tpu.memory_space<vmem>>, vector<32x64xf32>
      %cst_14 = arith.constant dense<0.000000e+00> : vector<8x64xf32>
      %16 = tpu.matmul %14, %15, %cst_14 {dimension_numbers = #tpu.dot_dimension_numbers<[1], [0], [0], [1], [0, 0, 1, 1], [], []>} : vector<8x32xf32>, vector<32x64xf32>, vector<8x64xf32> -> vector<8x64xf32>
      %c0_15 = arith.constant 0 : index
      %c0_16 = arith.constant 0 : index
      %17 = vector.load %arg4[%c0_15, %c0_16] : memref<1x64xf32, #tpu.memory_space<vmem>>, vector<1x64xf32>
      %18 = vector.broadcast %17 : vector<1x64xf32> to vector<8x64xf32>
      %19 = arith.addf %16, %18 : vector<8x64xf32>
      %cst_17 = arith.constant 0.000000e+00 : f32
      %20 = vector.broadcast %cst_17 : f32 to vector<8x64xf32>
      %21 = arith.maximumf %19, %20 : vector<8x64xf32>
      %c0_18 = arith.constant 0 : index
      %c0_19 = arith.constant 0 : index
      %22 = vector.load %arg5[%c0_18, %c0_19] : memref<64x8xf32, #tpu.memory_space<vmem>>, vector<64x8xf32>
      %cst_20 = arith.constant dense<0.000000e+00> : vector<8x8xf32>
      %23 = tpu.matmul %21, %22, %cst_20 {dimension_numbers = #tpu.dot_dimension_numbers<[1], [0], [0], [1], [0, 0, 1, 1], [], []>} : vector<8x64xf32>, vector<64x8xf32>, vector<8x8xf32> -> vector<8x8xf32>
      %c0_21 = arith.constant 0 : index
      %c0_22 = arith.constant 0 : index
      %24 = vector.load %arg6[%c0_21, %c0_22] : memref<1x8xf32, #tpu.memory_space<vmem>>, vector<1x8xf32>
      %25 = vector.broadcast %24 : vector<1x8xf32> to vector<8x8xf32>
      %26 = arith.addf %23, %25 : vector<8x8xf32>
      %c0_23 = arith.constant 0 : index
      %c0_24 = arith.constant 0 : index
      %27 = vector.load %arg8[%c0_23, %c0_24] : memref<8x8xf32, #tpu.memory_space<vmem>>, vector<8x8xf32>
      tpu.vector_store %arg8[%c0_23, %c0_24], %26 {strides = array<i32>} : memref<8x8xf32, #tpu.memory_space<vmem>>, vector<8x8xf32>,
      %c0_25 = arith.constant 0 : index
      %c0_26 = arith.constant 0 : index
      %28 = vector.load %arg7[%c0_25, %c0_26] : memref<8x8xf32, #tpu.memory_space<vmem>>, vector<8x8xf32>
      %cst_27 = arith.constant 0.000000e+00 : f32
      %29 = vector.broadcast %cst_27 : f32 to vector<8x8xf32>
      %30 = arith.maximumf %26, %29 : vector<8x8xf32>
      %31 = arith.mulf %26, %28 : vector<8x8xf32>
      %32 = arith.subf %30, %31 : vector<8x8xf32>
      %33 = math.absf %26 : vector<8x8xf32>
      %cst_28 = arith.constant 0.000000e+00 : f32
      %34 = vector.broadcast %cst_28 : f32 to vector<8x8xf32>
      %35 = arith.subf %34, %33 : vector<8x8xf32>
      %36 = math.exp %35 : vector<8x8xf32>
      %cst_29 = arith.constant 1.000000e+00 : f32
      %37 = vector.broadcast %cst_29 : f32 to vector<8x8xf32>
      %38 = arith.addf %37, %36 : vector<8x8xf32>
      %39 = math.log %38 : vector<8x8xf32>
      %40 = arith.addf %32, %39 : vector<8x8xf32>
      %c0_30 = arith.constant 0 : index
      %c0_31 = arith.constant 0 : index
      %41 = vector.load %arg9[%c0_30, %c0_31] : memref<8x8xf32, #tpu.memory_space<vmem>>, vector<8x8xf32>
      tpu.vector_store %arg9[%c0_30, %c0_31], %40 {strides = array<i32>} : memref<8x8xf32, #tpu.memory_space<vmem>>, vector<8x8xf32>,
    } else {
    }
    return
  }
  func.func @transform_0(%arg0: i32, %arg1: i32) -> (i32, i32, i32) {
    %c0_i32 = arith.constant 0 : i32
    %c0_i32_0 = arith.constant 0 : i32
    return %arg0, %arg1, %c0_i32 : i32, i32, i32
  }
  func.func @transform_1(%arg0: i32, %arg1: i32) -> (i32, i32) {
    %c0_i32 = arith.constant 0 : i32
    %c0_i32_0 = arith.constant 0 : i32
    %c0_i32_1 = arith.constant 0 : i32
    return %c0_i32, %c0_i32_0 : i32, i32
  }
  func.func @transform_2(%arg0: i32, %arg1: i32) -> (i32, i32) {
    %c0_i32 = arith.constant 0 : i32
    %c0_i32_0 = arith.constant 0 : i32
    %c0_i32_1 = arith.constant 0 : i32
    return %c0_i32, %c0_i32_0 : i32, i32
  }
  func.func @transform_3(%arg0: i32, %arg1: i32) -> (i32, i32) {
    %c0_i32 = arith.constant 0 : i32
    %c0_i32_0 = arith.constant 0 : i32
    %c0_i32_1 = arith.constant 0 : i32
    return %c0_i32, %c0_i32_0 : i32, i32
  }
  func.func @transform_4(%arg0: i32, %arg1: i32) -> (i32, i32) {
    %c0_i32 = arith.constant 0 : i32
    %c0_i32_0 = arith.constant 0 : i32
    %c0_i32_1 = arith.constant 0 : i32
    return %c0_i32, %c0_i32_0 : i32, i32
  }
  func.func @transform_5(%arg0: i32, %arg1: i32) -> (i32, i32) {
    %c0_i32 = arith.constant 0 : i32
    %c0_i32_0 = arith.constant 0 : i32
    return %arg0, %c0_i32 : i32, i32
  }
  func.func @transform_6(%arg0: i32, %arg1: i32) -> (i32, i32) {
    %c0_i32 = arith.constant 0 : i32
    %c0_i32_0 = arith.constant 0 : i32
    return %arg0, %c0_i32 : i32, i32
  }
  func.func @transform_7(%arg0: i32, %arg1: i32) -> (i32, i32) {
    %c0_i32 = arith.constant 0 : i32
    %c0_i32_0 = arith.constant 0 : i32
    return %arg0, %c0_i32 : i32, i32
  }
}

</mosaic_0001>

<bundles_post_ra>
// kernel: tpu_custom_call.1
= control target key start
LH: loop header
LB: loop body
LE: loop exit
PB: predicated region body
PF: predicated region fallthrough
CT: control target
= control target key end

     0   :  { %13 = vsyncpa [#allocation4], 0  ;;  %vm31_vm0 = vcmask 261120   ;;  %v496_v3 = vmov 0.0|0.0   ;;  %v497_v6 = vmov 0.0   ;;  %vm115_vm1 = vcmask 1041409   ;;  %s648_s0 = inlined_call_operand.vmem [shape: bf16[8,8,32], index: 0, kind: input, shape index: {}]   ;;  %s649_s1 = inlined_call_operand.vmem [shape: f32[32,64], index: 1, kind: input, shape index: {}]   ;;  %s650_s2 = inlined_call_operand.vmem [shape: f32[1,64], index: 2, kind: input, shape index: {}]   ;;  %s651_s3 = inlined_call_operand.vmem [shape: f32[64,8], index: 3, kind: input, shape index: {}]   ;;  %s652_s4 = inlined_call_operand.vmem [shape: f32[1,8], index: 4, kind: input, shape index: {}]   ;;  %s653_s5 = inlined_call_operand.vmem [shape: f32[8,8], index: 5, kind: input, shape index: {}]   ;;  %s654_s6 = inlined_call_operand.hbm [shape: f32[8,8], index: 6, kind: output, shape index: {0}]   ;;  %s655_s7 = inlined_call_operand.hbm [shape: f32[8,8], index: 7, kind: output, shape index: {1}]  }
   0x1   :  { %v137_v0 = vld [vmem:[%s649_s1] sm:$0xff]  ;;  %v138_v1 = vld [vmem:[%s649_s1 + $0x8] sm:$0xff]  ;;  %v139_v2 = vld [vmem:[%s649_s1 + $0x10] sm:$0xff]  ;;  %421 = vmatprep.subr.bf16.mxu0 %v496_v3  ;;  %32 = vst.msk [vmem:[#allocation2] sm:$0xff] %vm31_vm0, %v497_v6  ;;  %427 = vmatprep.subr.bf16.mxu1 %v496_v3 }
   0x2   :  { %v422_v4 = vpack.c.bf16 %v138_v1, %v137_v0  ;;  %v140_v5 = vld [vmem:[%s649_s1 + $0x18] sm:$0xff]  ;;  %v359_v7 = vld [vmem:[%s648_s0] sm:$0xff]   ;;  %v374_v8 = vld [vmem:[%s648_s0 + $0x8] sm:$0xff]  }
   0x3   :  { %v425_v9 = vpack.c.bf16 %v140_v5, %v139_v2  ;;  %v360_v10 = vunpack.c.l.bf16 %v359_v7  ;;  %v361_v11 = vunpack.c.h.bf16 %v359_v7  ;;  %v364_v12 = vunpack.c.l.bf16 %v374_v8  ;;  %v375_v13 = vld [vmem:[%s648_s0 + $0x10] sm:$0xff]   ;;  %v376_v14 = vld [vmem:[%s648_s0 + $0x18] sm:$0xff]  }
   0x4   :  { %423 = vmatpush3.bf16.msra.mxu0 %v422_v4  ;;  %v365_v15 = vunpack.c.h.bf16 %v374_v8  ;;  %v368_v16 = vunpack.c.l.bf16 %v375_v13  ;;  %v369_v17 = vunpack.c.h.bf16 %v375_v13  ;;  %v372_v18 = vunpack.c.l.bf16 %v376_v14 }
   0x5   :  { %424 = vmatprep.subr.bf16.mxu0 %v496_v3  ;;  %v373_v19 = vunpack.c.h.bf16 %v376_v14  ;;  %v51_v20 = vsel %vm31_vm0, %v360_v10, 0.0  ;;  %v58_v21 = vsel %vm31_vm0, %v361_v11, 0.0  ;;  %v65_v22 = vsel %vm31_vm0, %v364_v12, 0.0 }
   0x6   :  { %v52_v23 = vrot.slane %v51_v20, 4  ;;  %v59_v24 = vrot.slane %v58_v21, 4  ;;  %v66_v25 = vrot.slane %v65_v22, 4  ;;  %v72_v26 = vsel %vm31_vm0, %v365_v15, 0.0 }
   0x7   :  { %v73_v27 = vrot.slane %v72_v26, 4  ;;  %v79_v28 = vsel %vm31_vm0, %v368_v16, 0.0  ;;  %v86_v29 = vsel %vm31_vm0, %v369_v17, 0.0  ;;  %v93_v30 = vsel %vm31_vm0, %v372_v18, 0.0 }
   0x8   :  { %14 = vsyncpa [#allocation6], 0  ;;  %426 = vmatpush3.bf16.msra.mxu0 %v425_v9  ;;  %v53_v31 = vadd.f32 %v52_v23, %v51_v20  ;;  %v60_v32 = vadd.f32 %v59_v24, %v58_v21  ;;  %v67_v33 = vadd.f32 %v66_v25, %v65_v22  ;;  %v80_v34 = vrot.slane %v79_v28, 4  ;;  %v222_v11 = vld [vmem:[%s651_s3] sm:$0xff]  ;;  %v223_v12 = vld [vmem:[%s651_s3 + $0x8] sm:$0xff]  ;;  %s499_s12 = smov [#allocation3]  }
   0x9   :  { %vm117_vm2 = vcmask 1042434   ;;  %v74_v35 = vadd.f32 %v73_v27, %v72_v26  ;;  %v87_v36 = vrot.slane %v86_v29, 4  ;;  %v94_v37 = vrot.slane %v93_v30, 4  ;;  %v224_v18 = vld [vmem:[%s651_s3 + $0x10] sm:$0xff]  ;;  %v49_v23 = vld [vmem:[#allocation2] sm:$0xff]  ;;  %s332_s13 = sshll.u32 %s499_s12, 4  ;;  %s333_s13 = int_to_ptr.vmem [resolvable:$true] %s332_s13 }
   0xa   :  { %v100_v38 = vsel %vm31_vm0, %v373_v19, 0.0  ;;  %vm119_vm3 = vcmask 1043459   ;;  %v54_v39 = vrot.slane %v53_v31, 2  ;;  %v61_v40 = vrot.slane %v60_v32, 2  ;;  %v225_v19 = vld [vmem:[%s651_s3 + $0x18] sm:$0xff]  ;;  %p453_p1 = scmp.lt.s32.totalorder %s333_s13, %s333_s13 }
   0xb   :  { %v68_v41 = vrot.slane %v67_v33, 2  ;;  %v81_v42 = vadd.f32 %v80_v34, %v79_v28  ;;  %v75_v43 = vrot.slane %v74_v35, 2  ;;  %v88_v44 = vadd.f32 %v87_v36, %v86_v29  ;;  %v226_v28 = vld [vmem:[%s651_s3 + $0x20] sm:$0xff]  ;;  %v227_v29 = vld [vmem:[%s651_s3 + $0x28] sm:$0xff]  ;;  %v229_v34 = vld [vmem:[%s651_s3 + $0x38] sm:$0xff] }
   0xc   :  { %v95_v45 = vadd.f32 %v94_v37, %v93_v30  ;;  %v101_v46 = vrot.slane %v100_v38, 4  ;;  %v55_v47 = vadd.f32 %v54_v39, %v53_v31  ;;  %v62_v48 = vadd.f32 %v61_v40, %v60_v32  ;;  %v354_v36 = vld [vmem:[%s650_s2] ss:$0 sm:$0xff]  ;;  %s448_s2 = scalar_lea.vmem %s333_s13, 128 }
   0xd   :  { %v69_v49 = vadd.f32 %v68_v41, %v67_v33  ;;  %v82_v50 = vrot.slane %v81_v42, 2  ;;  %v76_v51 = vadd.f32 %v75_v43, %v74_v35  ;;  %v89_v52 = vrot.slane %v88_v44, 2  ;;  %v228_v33 = vld [vmem:[%s651_s3 + $0x30] sm:$0xff]  ;;  %v356_v40 = vld [vmem:[%s652_s4] ss:$0 sm:$0xff]  ;;  %p449_p0 = scmp.ne.s32.totalorder %s333_s13, %s448_s2  ;;  %p454_p2 = scmp.lt.s32.totalorder %s448_s2, %s448_s2 }
   0xe   :  { %v96_v53 = vrot.slane %v95_v45, 2  ;;  %v102_v54 = vadd.f32 %v101_v46, %v100_v38  ;;  %v56_v55 = vrot.slane %v55_v47, 1  ;;  %v63_v56 = vrot.slane %v62_v48, 1 }
   0xf   :  { %v70_v57 = vrot.slane %v69_v49, 1  ;;  %v83_v58 = vadd.f32 %v82_v50, %v81_v42  ;;  %v77_v59 = vrot.slane %v76_v51, 1  ;;  %v90_v60 = vadd.f32 %v89_v52, %v88_v44  ;;  %p455_p3 = por %p454_p2, %p453_p1 }
  0x10   :  { %v97_v61 = vadd.f32 %v96_v53, %v95_v45  ;;  %v103_v62 = vrot.slane %v102_v54, 2  ;;  %v57_v63 = vadd.f32 %v56_v55, %v55_v47  ;;  %v64_v0 = vadd.f32 %v63_v56, %v62_v48 }
  0x11   :  { %v71_v1 = vadd.f32 %v70_v57, %v69_v49  ;;  %v84_v2 = vrot.slane %v83_v58, 1  ;;  %v78_v4 = vadd.f32 %v77_v59, %v76_v51  ;;  %v91_v5 = vrot.slane %v90_v60, 1  ;;  %p456_p4 = pnand %p455_p3, %p449_p0 }
  0x12   :  { %v98_v7 = vrot.slane %v97_v61, 1  ;;  %v104_v8 = vadd.f32 %v103_v62, %v102_v54  ;;  %v116_v10 = vsel %vm115_vm1, %v64_v0, %v57_v63  ;;  %vm121_vm4 = vcmask 1044484  }
  0x13   :  { %v85_v9 = vadd.f32 %v84_v2, %v83_v58  ;;  %vm123_vm5 = vcmask 1045509   ;;  %v92_v13 = vadd.f32 %v91_v5, %v90_v60  ;;  %v118_v16 = vsel %vm117_vm2, %v71_v1, %v116_v10 }
  0x14   :  { %v99_v14 = vadd.f32 %v98_v7, %v97_v61  ;;  %v105_v15 = vrot.slane %v104_v8, 1  ;;  %v120_v17 = vsel %vm119_vm3, %v78_v4, %v118_v16  ;;  %vm125_vm6 = vcmask 1046534  }
  0x15   :  { %v122_v21 = vsel %vm121_vm4, %v85_v9, %v120_v17  ;;  %vm127_vm7 = vcmask 1047559   ;;  %vm498_vm8 = vmmov 0   ;;  %v428_v22 = vpack.c.bf16 %v223_v12, %v222_v11 }
  0x16   :  { %v106_v20 = vadd.f32 %v105_v15, %v104_v8  ;;  %399 = vmatprep.mubr.msk.f32.mxu0 %vm498_vm8, %v497_v6  ;;  %v124_v24 = vsel %vm123_vm5, %v92_v13, %v122_v21  ;;  %418 = vmatprep.mubr.msk.f32.mxu1 %vm498_vm8, %v497_v6  ;;  %v431_v26 = vpack.c.bf16 %v225_v19, %v224_v18  ;;  %vm237_vm9 = vcmask 523264  }
  0x17   :  { %v126_v25 = vsel %vm125_vm6, %v99_v14, %v124_v24  ;;  %429 = vmatpush3.bf16.msra.mxu1 %v428_v22  ;;  %v434_v31 = vpack.c.bf16 %v227_v29, %v226_v28  ;;  %v437_v35 = vpack.c.bf16 %v229_v34, %v228_v33  ;;  %vm311_vm10 = vcmask 64512  }
  0x18   :  { %v128_v27 = vsel %vm127_vm7, %v106_v20, %v126_v25  ;;  %430 = vmatprep.subr.bf16.mxu1 %v496_v3 }
  0x19   :  { %v130_v30 = vadd.f32 %v128_v27, %v49_v23 }
  0x1b   :  { %131 = vst.msk [vmem:[#allocation2] sm:$0xff] %vm31_vm0, %v130_v30  ;;  %432 = vmatpush3.bf16.msra.mxu1 %v431_v26 }
  0x1c   :  { %433 = vmatprep.subr.bf16.mxu1 %v496_v3 }
  0x1f   :  { %435 = vmatpush3.bf16.msra.mxu1 %v434_v31 }
  0x20   :  { %436 = vmatprep.subr.bf16.mxu1 %v496_v3 }
  0x22   :  { %v135_v6 = vld [vmem:[#allocation2] sm:$0xff] }
  0x23   :  { %v136_v32 = vmul.f32 0.125, %v135_v6  ;;  %438 = vmatpush3.bf16.msra.mxu1 %v437_v35 }
  0x25   :  { %400 = vmatmul.mubr.msk.f32.vlgmr.msra.gmra.mrb[0].mxu0 %vm31_vm0, %v136_v32 }
  0xf8   :  { %v217_v37 = vpop.f32.mrb[0].mxu0 }
  0xf9   :  { %v218_v3 = vadd.f32 %v354_v36, %v217_v37  ;;  %v401_v38 = vpop.f32.mrb[1].mxu0 }
  0xfb   :  { %v221_v39 = vmax.f32 %v218_v3, 0.0 }
  0xfd   :  { %419 = vmatmul.mubr.msk.f32.vlgmr.msra.gmra.mrb[0].mxu1 %vm237_vm9, %v221_v39 }
 0x1d0   :  { %v307_v41 = vpop.f32.mrb[0].mxu1 }
 0x1d1   :  { %v308_v42 = vadd.f32 %v356_v40, %v307_v41  ;;  %v420_v43 = vpop.f32.mrb[1].mxu1 }
 0x1d3   :  { %v317_v44 = vand.u32 2147483647, %v308_v42  ;;  %312 = vst.msk [vmem:[#allocation3] sm:$0xff] %vm311_vm10, %v308_v42 }
 0x1d4   :  { %459 = shalt.err (!%p456_p4)
}
 0x1d5   :  { %s460_s4 = scalar_lea.hbm %s654_s6, 128 }
 0x1d6   :  { %p461_p5 = scmp.ne.s32.totalorder %s654_s6, %s460_s4  ;;  %p464_p6 = scmp.lt.u32.totalorder %s460_s4, %s654_s6 }
 0x1d8   :  { %p466_p7 = pnand %p464_p6, %p461_p5 }
 0x1da   :  { %469 = shalt.err (!%p466_p7)
}
 0x1db   :  { %335 = dma.vmem_to_hbm [thread:$0]  %s333_s13, 128, %s654_s6, [#allocation4]   ;;  %v318_v45 = vsub.f32 0.0, %v317_v44  ;;  %v313_v49 = vld [vmem:[%s653_s5] sm:$0xff]  ;;  %v314_v50 = vmax.f32 %v308_v42, 0.0 }
 0x1dc   :  { %v315_v51 = vmul.f32 %v313_v49, %v308_v42  ;;  %s500_s21 = smov [#allocation5]  }
 0x1dd   :  { %v319_v46 = vmul.f32 1.442695, %v318_v45  ;;  %s342_s22 = sshll.u32 %s500_s21, 4  ;;  %s343_s22 = int_to_ptr.vmem [resolvable:$true] %s342_s22 }
 0x1de   :  { %v316_v53 = vsub.f32 %v314_v50, %v315_v51  ;;  %s470_s6 = scalar_lea.vmem %s343_s22, 128  ;;  %p475_p9 = scmp.lt.s32.totalorder %s343_s22, %s343_s22 }
 0x1df   :  { %444 = vpow2.f32 %v319_v46  ;;  %p471_p8 = scmp.ne.s32.totalorder %s343_s22, %s470_s6  ;;  %p476_p10 = scmp.lt.s32.totalorder %s470_s6, %s470_s6 }
 0x1e1   :  { %p477_p11 = por %p476_p10, %p475_p9 }
 0x1e3   :  { %p478_p12 = pnand %p477_p11, %p471_p8 }
 0x1e9   :  { %v445_v47 = vpop.eup %444 }
 0x1ea   :  { %v321_v48 = vadd.f32 1.0, %v445_v47 }
 0x1ec   :  { %446 = vlog2.f32 %v321_v48 }
 0x1f6   :  { %v447_v52 = vpop.eup %446 }
 0x1f7   :  { %v323_v54 = vmul.f32 0.6931472, %v447_v52 }
 0x1f9   :  { %v324_v55 = vadd.f32 %v323_v54, %v316_v53 }
 0x1fb   :  { %325 = vst.msk [vmem:[#allocation5] sm:$0xff] %vm311_vm10, %v324_v55 }
 0x1fc   :  { %481 = shalt.err (!%p478_p12)
}
 0x1fd   :  { %s482_s24 = scalar_lea.hbm %s655_s7, 128 }
 0x1fe   :  { %p483_p13 = scmp.ne.s32.totalorder %s655_s7, %s482_s24  ;;  %p486_p0 = scmp.lt.u32.totalorder %s482_s24, %s655_s7 }
 0x200   :  { %p488_p1 = pnand %p486_p0, %p483_p13 }
 0x202   :  { %491 = shalt.err (!%p488_p1)
}
 0x203   :  { %345 = dma.vmem_to_hbm [thread:$0]  %s343_s22, 128, %s655_s7, [#allocation6]  }
 0x204   :  { %492 = dma.done.wait [#allocation4], 128  }
 0x205   :  { %493 = vsyncadd [#allocation4], 4294967168 }
 0x206   :  { %494 = dma.done.wait [#allocation6], 128  }
 0x207   :  { %495 = vsyncadd [#allocation6], 4294967168 }
 0x208   :  { %352 = vsyncpa [#allocation4], 1 }
 0x209   :  { %353 = vsyncpa [#allocation6], 1 }

</bundles_post_ra>
